<compile_context>
chip_gen: v6e
topology: v6e:2x2x1
jax: 0.10.0
libtpu: 0.0.40
codegen_flags: <defaults>
</compile_context>

<pallas_src>
import jax
import jax.numpy as jnp
from jax.experimental import pallas as pl
from jax.experimental.pallas import tpu as pltpu


def _resize_conv_kernel(x_ref, w_ref, b_ref, o_ref):
    """One batch block per grid step: a single wide MXU matmul.

    x_ref: (nb, Hin, Kpad)   H-im2col'd, zero-padded small images (K fused on lanes)
    w_ref: (Kpad, Ncol)      block-Toeplitz sub-pixel weights, cols = (co, ph, wb, pw)
    b_ref: (1, Ncol)         bias tiled over (ph, wb, pw)
    o_ref: (nb, Hin, Ncol)   lane-dense store (Ncol is a multiple of 128)
    """
    nb, hin, kp = x_ref.shape
    ncol = o_ref.shape[-1]
    m = nb * hin
    lhs = x_ref[...].reshape(m, kp)              # collapse leading dims only (layout-free)
    acc = jnp.dot(lhs, w_ref[...], preferred_element_type=jnp.float32)
    acc = acc + b_ref[...]                       # (1, Ncol) broadcast add of the bias
    o_ref[...] = acc.reshape(nb, hin, ncol).astype(o_ref.dtype)


def resize_conv2d(x_nchw, weight_oihw, bias, *, scale_factor, padding=1):
    """Pallas implementation of ResizeConv2d.forward (nearest upsample + Conv2d).

    x_nchw:      (N, Cin, Hin, Win)
    weight_oihw: (Cout, Cin, KH, KW)   PyTorch Conv2d layout
    bias:        (Cout,)
    returns:     (N, Cout, Hin*s, Win*s)
    """
    N, Cin, Hin, Win = x_nchw.shape
    Cout, _, KH, KW = weight_oihw.shape
    s = int(scale_factor)
    p = int(padding)

    # Fused sub-pixel formulation assumes a 'same' conv after upsampling
    # (the module's intended use: kernel_size=3, padding=1).
    # TODO(synk): general kernel_size/padding combos with 2*padding != kernel_size-1.
    assert 2 * p == KH - 1 and 2 * p == KW - 1, "expected 'same' conv (e.g. k=3, pad=1)"

    # ---- phase decomposition: range of source-pixel offsets touched by any tap ----
    omin_h = (0 - p) // s
    omax_h = (s - 1 + KH - 1 - p) // s
    omin_w = (0 - p) // s
    omax_w = (s - 1 + KW - 1 - p) // s
    khe = omax_h - omin_h + 1
    kwe = omax_w - omin_w + 1
    padlo_h, padhi_h = max(0, -omin_h), max(0, omax_h)
    padlo_w, padhi_w = max(0, -omin_w), max(0, omax_w)
    row_shift = omin_h + padlo_h          # 0 for the usual p >= 1 case
    col_shift = omin_w + padlo_w
    hpad = Hin + padlo_h + padhi_h
    wpad = Win + padlo_w + padhi_w

    f32 = jnp.float32

    # ---- effective sub-pixel weights: sum taps that read the same source pixel ----
    # Cout is placed outermost in the column block so kernel output columns are
    # ordered (co, ph, wb, pw): the post-kernel layout pass becomes a cheap hb<->co
    # swap with contiguous s*Win*s inner runs.
    w_hwio = jnp.transpose(weight_oihw, (2, 3, 1, 0)).astype(f32)   # (KH, KW, Cin, Cout)
    w_small = jnp.zeros((khe, kwe, Cin, Cout, s, s), f32)
    for dh in range(KH):
        for dw in range(KW):
            for ph in range(s):
                for pw in range(s):
                    a = (ph + dh - p) // s - omin_h
                    c = (pw + dw - p) // s - omin_w
                    w_small = w_small.at[a, c, :, :, ph, pw].add(w_hwio[dh, dw])

    # ---- block-Toeplitz expansion over W, with the khe row taps fused into K ----
    # TODO(synk): for large Win/Cin/Cout tile Win on a second grid axis instead of
    # materializing the full (Kpad, Ncol) weight matrix.
    ncol = Cout * s * Win * s
    w_big = jnp.zeros((khe, wpad, Cin, Cout, s, Win, s), f32)
    for wb in range(Win):
        lo = wb + col_shift
        w_big = w_big.at[:, lo:lo + kwe, :, :, :, wb, :].set(w_small)
    kfused = khe * wpad * Cin
    kpad = ((kfused + 127) // 128) * 128                 # pad K to native lane/MXU width
    w_mat = jnp.pad(w_big.reshape(kfused, ncol), ((0, kpad - kfused), (0, 0)))

    b_row = jnp.repeat(bias.astype(f32), s * Win * s).reshape(1, ncol)

    # ---- wrapper-side layout: NHWC small input, zero pad, H im2col, K fuse ----
    x_nhwc = jnp.transpose(x_nchw, (0, 2, 3, 1))
    x_pad = jnp.pad(x_nhwc, ((0, 0), (padlo_h, padhi_h), (padlo_w, padhi_w), (0, 0)))
    rows = [x_pad[:, a + row_shift:a + row_shift + Hin].reshape(N, Hin, wpad * Cin)
            for a in range(khe)]
    x_in = jnp.pad(jnp.concatenate(rows, axis=-1),
                   ((0, 0), (0, 0), (0, kpad - kfused)))             # (N, Hin, Kpad)

    # ---- generation-aware block sizing (v5e/v6e: 128 MiB VMEM, v7x: 64 MiB) ----
    try:
        vmem_cap = int(pltpu.get_tpu_info().vmem_capacity_bytes)
    except Exception:  # conservative fallback if the hardware query is unavailable
        vmem_cap = 64 * 1024 * 1024
    vmem_limit = min(64 * 1024 * 1024, (vmem_cap * 3) // 4)  # 64 MiB v5e/v6e, 48 MiB v7x
    block_budget = vmem_limit // 3                           # headroom for scratch/spills

    bytes_f32 = 4
    per_img = bytes_f32 * (2 * Hin * kpad        # input block (double-buffered)
                           + 2 * Hin * ncol      # output block (double-buffered)
                           + 2 * Hin * ncol)     # f32 accumulator + dot result
    fixed = bytes_f32 * 2 * (kpad * ncol + 8 * ncol)   # weight + bias blocks (dbl-buffered)
    nb = max(1, min(N,
                    (block_budget - fixed) // per_img,   # VMEM budget
                    max(1, 1024 // Hin)))                # keep matmul M = nb*Hin <= ~1024
    if N >= 2:
        nb = min(nb, max(1, N // 2))   # >= 2 grid steps: pipeline overlap + both v7x TCs

    n_pad = ((N + nb - 1) // nb) * nb            # pad the batch instead of shrinking nb
    if n_pad != N:
        x_in = jnp.pad(x_in, ((0, n_pad - N), (0, 0), (0, 0)))

    y = pl.pallas_call(
        _resize_conv_kernel,
        out_shape=jax.ShapeDtypeStruct((n_pad, Hin, ncol), x_nchw.dtype),
        grid=(n_pad // nb,),
        in_specs=[
            pl.BlockSpec((nb, Hin, kpad), lambda n: (n, 0, 0)),
            pl.BlockSpec((kpad, ncol), lambda n: (0, 0)),   # grid-constant weights
            pl.BlockSpec((1, ncol), lambda n: (0, 0)),      # grid-constant bias
        ],
        out_specs=pl.BlockSpec((nb, Hin, ncol), lambda n: (n, 0, 0)),
        compiler_params=pltpu.CompilerParams(
            dimension_semantics=("parallel",),
            vmem_limit_bytes=vmem_limit),
    )(x_in, w_mat, b_row)

    # Pixel-shuffle interleave + NHWC->NCHW.  Columns are already (co, ph, wb, pw),
    # so this is just an hb<->co swap with contiguous s*Win*s-element inner runs.
    y = y[:N].reshape(N, Hin, Cout, s, Win, s)        # (n, hb, co, ph, wb, pw)
    y = jnp.transpose(y, (0, 2, 1, 3, 4, 5))          # (n, co, hb, ph, wb, pw)
    return y.reshape(N, Cout, Hin * s, Win * s)


def _reference(x_nchw, weight_oihw, bias, *, scale_factor, padding=1):
    """Plain-JAX reference matching F.interpolate(nearest) + Conv2d(stride=1, pad=1)."""
    s = scale_factor
    x_nhwc = jnp.transpose(x_nchw, (0, 2, 3, 1))
    x_up = jnp.repeat(jnp.repeat(x_nhwc, s, axis=1), s, axis=2)
    w_hwio = jnp.transpose(weight_oihw, (2, 3, 1, 0))
    out = jax.lax.conv_general_dilated(
        x_up, w_hwio, window_strides=(1, 1),
        padding=((padding, padding), (padding, padding)),
        dimension_numbers=("NHWC", "HWIO", "NHWC"),
        precision=jax.lax.Precision.HIGHEST)
    out = out + bias.reshape(1, 1, 1, -1)
    return jnp.transpose(out, (0, 3, 1, 2))


if __name__ == "__main__":
    # Module config: in_channels=4, out_channels=8, kernel_size=3, scale_factor=2
    in_channels, out_channels, kernel_size, scale_factor = 4, 8, 3, 2
    N, Hin, Win = 2, 16, 16

    key = jax.random.PRNGKey(0)
    kx, kw, kb = jax.random.split(key, 3)
    x = jax.random.normal(kx, (N, in_channels, Hin, Win), dtype=jnp.float32)
    # Deterministic synthetic Conv2d parameters (PyTorch OIHW weight layout).
    fan_in = in_channels * kernel_size * kernel_size
    bound = 1.0 / (fan_in ** 0.5)
    weight = jax.random.uniform(
        kw, (out_channels, in_channels, kernel_size, kernel_size),
        minval=-bound, maxval=bound, dtype=jnp.float32)
    bias = jax.random.uniform(
        kb, (out_channels,), minval=-bound, maxval=bound, dtype=jnp.float32)

    out = resize_conv2d(x, weight, bias, scale_factor=scale_factor)
    out = jax.block_until_ready(out)

    ref = _reference(x, weight, bias, scale_factor=scale_factor)
    assert out.shape == (N, out_channels, Hin * scale_factor, Win * scale_factor)
    assert jnp.allclose(out, ref, atol=1e-3, rtol=1e-3), "mismatch vs reference"

    print("KERNEL_OK")
</pallas_src>

<mosaic_0001>
module attributes {stable_mosaic.version = 11 : i64} {
  func.func @_resize_conv_kernel(%arg0: i32, %arg1: memref<1x16x256xf32, #tpu.memory_space<vmem>>, %arg2: memref<256x512xf32, #tpu.memory_space<vmem>>, %arg3: memref<1x512xf32, #tpu.memory_space<vmem>>, %arg4: memref<1x16x512xf32, #tpu.memory_space<vmem>>) attributes {dimension_semantics = [#tpu.dimension_semantics<parallel>], iteration_bounds = array<i64: 2>, scalar_prefetch = 0 : i64, scratch_operands = 0 : i64, tpu.core_type = #tpu.core_type<tc>, window_params = [{transform_indices = @transform_0, window_bounds = array<i64: 1, 16, 256>}, {pipeline_mode = #tpu.pipeline_mode<synchronous>, transform_indices = @transform_1, window_bounds = array<i64: 256, 512>}, {pipeline_mode = #tpu.pipeline_mode<synchronous>, transform_indices = @transform_2, window_bounds = array<i64: 1, 512>}, {transform_indices = @transform_3, window_bounds = array<i64: 1, 16, 512>}]} {
    %c0 = arith.constant 0 : index
    %c0_0 = arith.constant 0 : index
    %c0_1 = arith.constant 0 : index
    %0 = vector.load %arg1[%c0, %c0_0, %c0_1] : memref<1x16x256xf32, #tpu.memory_space<vmem>>, vector<1x16x256xf32>
    %1 = vector.shape_cast %0 : vector<1x16x256xf32> to vector<16x256xf32>
    %c0_2 = arith.constant 0 : index
    %c0_3 = arith.constant 0 : index
    %2 = vector.load %arg2[%c0_2, %c0_3] : memref<256x512xf32, #tpu.memory_space<vmem>>, vector<256x512xf32>
    %cst = arith.constant dense<0.000000e+00> : vector<16x512xf32>
    %3 = tpu.matmul %1, %2, %cst {dimension_numbers = #tpu.dot_dimension_numbers<[1], [0], [0], [1], [0, 0, 1, 1], [], []>} : vector<16x256xf32>, vector<256x512xf32>, vector<16x512xf32> -> vector<16x512xf32>
    %c0_4 = arith.constant 0 : index
    %c0_5 = arith.constant 0 : index
    %4 = vector.load %arg3[%c0_4, %c0_5] : memref<1x512xf32, #tpu.memory_space<vmem>>, vector<1x512xf32>
    %5 = vector.broadcast %4 : vector<1x512xf32> to vector<16x512xf32>
    %6 = arith.addf %3, %5 : vector<16x512xf32>
    %7 = vector.shape_cast %6 : vector<16x512xf32> to vector<1x16x512xf32>
    %c0_6 = arith.constant 0 : index
    %c0_7 = arith.constant 0 : index
    %c0_8 = arith.constant 0 : index
    %8 = vector.load %arg4[%c0_6, %c0_7, %c0_8] : memref<1x16x512xf32, #tpu.memory_space<vmem>>, vector<1x16x512xf32>
    tpu.vector_store %arg4[%c0_6, %c0_7, %c0_8], %7 {strides = array<i32>} : memref<1x16x512xf32, #tpu.memory_space<vmem>>, vector<1x16x512xf32>,
    return
  }
  func.func @transform_0(%arg0: i32) -> (i32, i32, i32) {
    %c0_i32 = arith.constant 0 : i32
    %c0_i32_0 = arith.constant 0 : i32
    %c0_i32_1 = arith.constant 0 : i32
    return %arg0, %c0_i32, %c0_i32_0 : i32, i32, i32
  }
  func.func @transform_1(%arg0: i32) -> (i32, i32) {
    %c0_i32 = arith.constant 0 : i32
    %c0_i32_0 = arith.constant 0 : i32
    %c0_i32_1 = arith.constant 0 : i32
    return %c0_i32, %c0_i32_0 : i32, i32
  }
  func.func @transform_2(%arg0: i32) -> (i32, i32) {
    %c0_i32 = arith.constant 0 : i32
    %c0_i32_0 = arith.constant 0 : i32
    %c0_i32_1 = arith.constant 0 : i32
    return %c0_i32, %c0_i32_0 : i32, i32
  }
  func.func @transform_3(%arg0: i32) -> (i32, i32, i32) {
    %c0_i32 = arith.constant 0 : i32
    %c0_i32_0 = arith.constant 0 : i32
    %c0_i32_1 = arith.constant 0 : i32
    return %arg0, %c0_i32, %c0_i32_0 : i32, i32, i32
  }
}

</mosaic_0001>

<bundles_post_ra>
// kernel: tpu_custom_call.1
= control target key start
LH: loop header
LB: loop body
LE: loop exit
PB: predicated region body
PF: predicated region fallthrough
CT: control target
= control target key end

     0   :  { %8 = vsyncpa [#allocation3], 0  ;;  %s1106_s0 = inlined_call_operand.hbm [shape: f32[2,16,256], index: 0, kind: input, shape index: {}]   ;;  %s1107_s1 = inlined_call_operand.hbm [shape: f32[256,512], index: 1, kind: input, shape index: {}]   ;;  %s1108_s2 = inlined_call_operand.hbm [shape: f32[1,512], index: 2, kind: input, shape index: {}]   ;;  %s1109_s3 = inlined_call_operand.hbm [shape: f32[2,16,512], index: 3, kind: output, shape index: {}]  }
   0x1   :  { %10 = vsyncpa [#allocation3 + $0x1], 0 }
   0x2   :  { %11 = vsyncpa [#allocation6], 0 }
   0x3   :  { %12 = vsyncpa [#allocation4], 0 }
   0x4   :  { %14 = vsyncpa [#allocation4 + $0x1], 0  ;;  %s911_s12 = smov 0   ;;  %s913_s13 = smov 0  }
   0x5   :  { %s915_s14 = smov 0   ;;  %s917_s15 = smov 0  }
   0x6 LB: > { %s932_s16 = sadd.s32 4294967295, %s879_s15   ;;  %s638_s17 = sadd.s32 4294967294, %s879_s15   ;;  %s879_s15 = sphi %s917_s15, %s1131_s15   ;;  %s875_s14 = sphi %s915_s14, %s1130_s14   ;;  %s871_s13 = sphi %s913_s13, %s1129_s13   ;;  %s867_s12 = sphi %s911_s12, %s1128_s12  }
   0x7   : > { %p40_p0 = scmp.ne.s32.totalorder %s871_s13, %s867_s12  ;;  %p1110_p1 = scmp.eq.s32.totalorder %s932_s16, 0 }
   0x8   : > { %p112_p3 = scmp.eq.s32.totalorder %s638_s17, 1  ;;  %p639_p5 = scmp.ge.s32.totalorder %s879_s15, 1 }
   0x9   : > { %p941_p4 = por %p1110_p1, %p40_p0  ;;  %p119_p7 = scmp.lt.s32.totalorder %s879_s15, 3 }
   0xa   : > { %p946_p6 = por %p112_p3, %p40_p0  ;;  %s881_s21 = smov [#allocation5]  }
   0xb   : > { %s1114_s18 = scalar_select %p941_p4, 1, 0 }
   0xc   : > { %s1115_s19 = scalar_select %p946_p6, 1, 0 }
   0xd   : > { %p951_p8 = pnand %p639_p5, %p119_p7  ;;  %s131_s22 = sshll.u32 %s881_s21, 4  ;;  %s132_s22 = int_to_ptr.vmem [resolvable:$true] %s131_s22 }
   0xe   : > { %s882_s24 = smov [#allocation7]   ;;  %s742_s26 = scalar_lea.vmem %s132_s22, 16384 }
   0xf   : > { %s1116_s20 = scalar_select %p951_p8, 1, 0 }
  0x10   : > { %p670_p9 = pneg %p951_p8  ;;  %s145_s25 = sshll.u32 %s882_s24, 4  ;;  %s146_s25 = int_to_ptr.vmem [resolvable:$true] %s145_s25 }
  0x11   : > { %p743_p13 = scmp.ne.s32.totalorder %s132_s22, %s742_s26  ;;  %p750_p5 = scmp.lt.s32.totalorder %s132_s22, %s132_s22 }
  0x12   : > { %p960_p11 = pnand %p670_p9, %p1110_p1  ;;  %p751_p7 = scmp.lt.s32.totalorder %s742_s26, %s742_s26 }
  0x14   : > { %p733_p12 = pneg %p960_p11  ;;  %p752_p10 = por %p751_p7, %p750_p5 }
  0x16   : > { %p745_p0 = pnand %p743_p13, %p733_p12 }
  0x18   : > { %p746_p3 = pneg %p745_p0 }
  0x1a   : > { %p753_p9 = pnand %p752_p10, %p746_p3 }
  0x1c   : > { %756 = shalt.err (!%p753_p9)
}
  0x1d   : > { %s883_s27 = smov 512   ;;  %s884_s28 = smov 32  }
  0x1e   : > { %673 = dma.hbm_to_vmem [thread:$0]  (!%p960_p11), %s1107_s1, 16384, %s132_s22, [#allocation6], %s883_s27, %s883_s27, %s884_s28  }
  0x1f   : > { %s768_s4 = scalar_lea.vmem %s146_s25, 64  ;;  %p776_p2 = scmp.lt.s32.totalorder %s146_s25, %s146_s25 }
  0x20   : > { %p769_p1 = scmp.ne.s32.totalorder %s146_s25, %s768_s4  ;;  %p777_p6 = scmp.lt.s32.totalorder %s768_s4, %s768_s4 }
  0x22   : > { %p771_p13 = pnand %p769_p1, %p733_p12  ;;  %p778_p5 = por %p777_p6, %p776_p2 }
  0x24   : > { %p772_p0 = pneg %p771_p13 }
  0x26   : > { %p779_p10 = pnand %p778_p5, %p772_p0 }
  0x28   : > { %782 = shalt.err (!%p779_p10)
}
  0x29   : > { %676 = dma.hbm_to_vmem [thread:$0]  (!%p960_p11), %s1108_s2, 64, %s146_s25, [#allocation6]  }
  0x2a   : > { %s983_s7 = sadd.s32 1, %s879_s15   ;;  %s27_s8 = sadd.s32 1, %s875_s14 }
  0x2b   : > { %s24_s9 = ssub.s32 %s879_s15, %s983_s7  ;;  %p34_p1 = scmp.ne.s32.totalorder %s875_s14, %s871_s13 }
  0x2c   : > { %p25_p2 = scmp.eq.s32.totalorder %s24_s9, 0  ;;  %p35_p6 = scmp.eq.s32.totalorder %s879_s15, 0 }
  0x2d   : > { %p1118_p12 = scmp.eq.s32.totalorder %s932_s16, 1  ;;  %p687_p7 = scmp.lt.s32.totalorder %s879_s15, 2 }
  0x2e   : > { %s999_s11 = scalar_select %p25_p2, %s875_s14, %s27_s8  }
  0x2f   : > { %p993_p3 = por %p1118_p12, %p34_p1  ;;  %p36_p9 = por %p35_p6, %p34_p1 }
  0x30   : > { %s156_s17 = sand.u32 1, %s875_s14   ;;  %s656_s22 = sshll.u32 %s879_s15, 9 }
  0x31   : > { %s1119_s10 = scalar_select %p993_p3, 1, 0 }
  0x32   : > { %s643_s21 = sshll.u32 %s156_s17, 5  ;;  %s1006_s25 = scalar_lea.hbm %s1106_s0, %s656_s22 }
  0x33   : > { %s160_s26 = scalar_lea.vmem [#allocation2], %s643_s21  ;;  %p1010_p11 = pnand %p687_p7, %p36_p9 }
  0x34   : > { %s167_s27 = sshll.u32 %s160_s26, 4  ;;  %s1014_s29 = scalar_lea.sflag [#allocation3], %s156_s17  ;;  %s1008_s27 = int_to_ptr.vmem [resolvable:$true] %s167_s27 }
  0x35   : > { %s783_s30 = scalar_lea.hbm %s1006_s25, 512  ;;  %p785_p0 = pneg %p1010_p11 }
  0x36   : > { %p784_p13 = scmp.ne.s32.totalorder %s1006_s25, %s783_s30  ;;  %s788_s6 = scalar_lea.hbm %s1106_s0, 1024 }
  0x37   : > { %p789_p1 = scmp.lt.s32.totalorder %s1006_s25, %s1106_s0  ;;  %p790_p2 = scmp.lt.s32.totalorder %s788_s6, %s783_s30 }
  0x38   : > { %p786_p5 = pnand %p785_p0, %p784_p13 }
  0x39   : > { %p791_p6 = por %p790_p2, %p789_p1 }
  0x3a   : > { %p787_p10 = pneg %p786_p5 }
  0x3c   : > { %p792_p12 = pnand %p791_p6, %p787_p10 }
  0x3e   : > { %795 = shalt.err (!%p792_p12)
}
  0x3f   : > { %s796_s17 = scalar_lea.vmem %s1008_s27, 512  ;;  %s885_s21 = smov [#allocation2]  }
  0x40   : > { %p797_p7 = scmp.ne.s32.totalorder %s1008_s27, %s796_s17  ;;  %s801_s22 = sshll.u32 %s885_s21, 4  ;;  %s802_s22 = int_to_ptr.vmem [resolvable:$false] %s801_s22 }
  0x41   : > { %s803_s23 = scalar_lea.vmem %s802_s22, 1024  ;;  %p804_p5 = scmp.lt.s32.totalorder %s1008_s27, %s802_s22 }
  0x42   : > { %p799_p9 = pnand %p797_p7, %p785_p0  ;;  %p805_p3 = scmp.lt.s32.totalorder %s803_s23, %s796_s17 }
  0x44   : > { %p800_p13 = pneg %p799_p9  ;;  %p806_p4 = por %p805_p3, %p804_p5 }
  0x46   : > { %p807_p8 = pnand %p806_p4, %p800_p13 }
  0x48   : > { %810 = shalt.err (!%p807_p8)
}
  0x49   : > { %s886_s24 = smov 256   ;;  %s887_s26 = smov 16  }
  0x4a   : > { %680 = dma.hbm_to_vmem [thread:$0]  (!%p1010_p11), %s1006_s25, 512, %s1008_s27, %s1014_s29, %s886_s24, %s886_s24, %s887_s26  }
  0x4b   : > { %p1121_p0 = scmp.ne.s32.totalorder %s1116_s20, 0 }
  0x4c   : > { %s1038_s30 = sand.u32 (!%p1121_p0), 1, %s871_s13   ;;  %p1122_p4 = scmp.ne.s32.totalorder (!%p1121_p0), %s1114_s18, 0 }
  0x4d   : > { %179 = sbr.rel (%p1121_p0) target bundleno = 367 (0x16f), region = 32  ;;  %s647_s4 = sshll.u32 (!%p1121_p0), %s1038_s30, 5 }
  0x4e   : > { %s182_s5 = scalar_lea.sflag (!%p1121_p0), [#allocation3], %s1038_s30  ;;  %s1042_s6 = scalar_lea.vmem (!%p1121_p0), [#allocation2], %s647_s4 }
  0x52   : > { %854 = dma.done.wait (%p1122_p4), %s182_s5, 512  }
  0x53   : > { %856 = vsyncadd (%p1122_p4), %s182_s5, 4294966784  ;;  %p1123_p8 = scmp.eq.s32.totalorder %s932_s16, 0 }
  0x55   : > { %858 = dma.done.wait (%p1123_p8), [#allocation6], 16448   ;;  %p1124_p3 = pmov %p1123_p8 }
  0x56   : > { %v281_v0 = vld [vmem:[#allocation5 + $0x1e8] sm:$0xff]  ;;  %v283_v1 = vld [vmem:[#allocation5 + $0x1f8] sm:$0xff]  ;;  %v280_v2 = vld [vmem:[#allocation5 + $0x1e0] sm:$0xff]  ;;  %s650_s18 = sshll.u32 %s1038_s30, 6  ;;  %s657_s27 = sshll.u32 %s932_s16, 10 }
  0x57   : > { %860 = vsyncadd (%p1124_p3), [#allocation6], 4294950848  ;;  %370 = vmatprep.subr.mxu0 %v281_v0  ;;  %447 = vmatprep.subr.mxu1 %v283_v1  ;;  %v282_v3 = vld [vmem:[#allocation5 + $0x1f0] sm:$0xff]  ;;  %v277_v4 = vld [vmem:[#allocation5 + $0x1c8] sm:$0xff]  ;;  %s215_s20 = scalar_lea.vmem [#allocation8], %s650_s18  ;;  %s1063_s8 = scalar_lea.hbm %s1109_s3, %s657_s27 }
  0x58   : > { %v279_v5 = vld [vmem:[#allocation5 + $0x1d8] sm:$0xff]  ;;  %371 = vmatpush1.msra.mxu0 %v280_v2  ;;  %448 = vmatpush1.msra.mxu1 %v282_v3  ;;  %v276_v6 = vld [vmem:[#allocation5 + $0x1c0] sm:$0xff]  ;;  %v278_v7 = vld [vmem:[#allocation5 + $0x1d0] sm:$0xff]  ;;  %s546_s25 = sshll.u32 %s215_s20, 4  ;;  %s533_s16 = scalar_lea.sflag [#allocation4], %s1038_s30  ;;  %s1058_s25 = int_to_ptr.vmem [resolvable:$true] %s546_s25 }
  0x59   : > { %v273_v8 = vld [vmem:[#allocation5 + $0x1a8] sm:$0xff]  ;;  %372 = vmatprep.subr.mxu0 %v277_v4  ;;  %449 = vmatprep.subr.mxu1 %v279_v5  ;;  %v275_v9 = vld [vmem:[#allocation5 + $0x1b8] sm:$0xff]  ;;  %v272_v10 = vld [vmem:[#allocation5 + $0x1a0] sm:$0xff]  ;;  %s811_s9 = scalar_lea.vmem %s1058_s25, 1024  ;;  %p1125_p10 = scmp.ne.s32.totalorder %s1119_s10, 0 }
  0x5a   : > { %v274_v11 = vld [vmem:[#allocation5 + $0x1b0] sm:$0xff]  ;;  %373 = vmatpush1.msra.mxu0 %v276_v6  ;;  %450 = vmatpush1.msra.mxu1 %v278_v7  ;;  %v269_v12 = vld [vmem:[#allocation5 + $0x188] sm:$0xff]  ;;  %v271_v13 = vld [vmem:[#allocation5 + $0x198] sm:$0xff]  ;;  %p812_p11 = scmp.ne.s32.totalorder %s1058_s25, %s811_s9  ;;  %s888_s17 = smov [#allocation8]  }
  0x5b   : > { %374 = vmatprep.subr.mxu0 %v273_v8  ;;  %451 = vmatprep.subr.mxu1 %v275_v9  ;;  %v268_v14 = vld [vmem:[#allocation5 + $0x180] sm:$0xff]  ;;  %v270_v15 = vld [vmem:[#allocation5 + $0x190] sm:$0xff]  ;;  %v265_v16 = vld [vmem:[#allocation5 + $0x168] sm:$0xff]  ;;  %s815_s21 = sshll.u32 %s888_s17, 4  ;;  %s816_s21 = int_to_ptr.vmem [resolvable:$false] %s815_s21 }
  0x5c   : > { %375 = vmatpush1.msra.mxu0 %v272_v10  ;;  %452 = vmatpush1.msra.mxu1 %v274_v11  ;;  %v267_v17 = vld [vmem:[#allocation5 + $0x178] sm:$0xff]  ;;  %v264_v18 = vld [vmem:[#allocation5 + $0x160] sm:$0xff]  ;;  %v266_v19 = vld [vmem:[#allocation5 + $0x170] sm:$0xff]  ;;  %p813_p1 = pnand %p812_p11, %p1125_p10  ;;  %s817_s22 = scalar_lea.vmem %s816_s21, 2048 }
  0x5d   : > { %376 = vmatprep.subr.mxu0 %v269_v12  ;;  %453 = vmatprep.subr.mxu1 %v271_v13  ;;  %v261_v20 = vld [vmem:[#allocation5 + $0x148] sm:$0xff]  ;;  %v263_v21 = vld [vmem:[#allocation5 + $0x158] sm:$0xff]  ;;  %v260_v22 = vld [vmem:[#allocation5 + $0x140] sm:$0xff]  ;;  %p818_p6 = scmp.lt.s32.totalorder %s1058_s25, %s816_s21  ;;  %p819_p12 = scmp.lt.s32.totalorder %s817_s22, %s811_s9 }
  0x5e   : > { %377 = vmatpush1.msra.mxu0 %v268_v14  ;;  %454 = vmatpush1.msra.mxu1 %v270_v15  ;;  %v262_v23 = vld [vmem:[#allocation5 + $0x150] sm:$0xff]  ;;  %v257_v24 = vld [vmem:[#allocation5 + $0x128] sm:$0xff]  ;;  %v259_v25 = vld [vmem:[#allocation5 + $0x138] sm:$0xff]  ;;  %p814_p2 = pneg %p813_p1 }
  0x5f   : > { %378 = vmatprep.subr.mxu0 %v265_v16  ;;  %455 = vmatprep.subr.mxu1 %v267_v17  ;;  %v256_v26 = vld [vmem:[#allocation5 + $0x120] sm:$0xff]  ;;  %v258_v27 = vld [vmem:[#allocation5 + $0x130] sm:$0xff]  ;;  %v253_v28 = vld [vmem:[#allocation5 + $0x108] sm:$0xff]  ;;  %p820_p7 = por %p819_p12, %p818_p6 }
  0x60   : > { %379 = vmatpush1.msra.mxu0 %v264_v18  ;;  %456 = vmatpush1.msra.mxu1 %v266_v19  ;;  %v255_v29 = vld [vmem:[#allocation5 + $0x118] sm:$0xff]  ;;  %v252_v30 = vld [vmem:[#allocation5 + $0x100] sm:$0xff]  ;;  %v254_v31 = vld [vmem:[#allocation5 + $0x110] sm:$0xff] }
  0x61   : > { %380 = vmatprep.subr.mxu0 %v261_v20  ;;  %457 = vmatprep.subr.mxu1 %v263_v21  ;;  %v249_v32 = vld [vmem:[#allocation5 + $0xe8] sm:$0xff]  ;;  %v251_v33 = vld [vmem:[#allocation5 + $0xf8] sm:$0xff]  ;;  %v248_v34 = vld [vmem:[#allocation5 + $0xe0] sm:$0xff]  ;;  %p821_p9 = pnand %p820_p7, %p814_p2 }
  0x62   : > { %381 = vmatpush1.msra.mxu0 %v260_v22  ;;  %458 = vmatpush1.msra.mxu1 %v262_v23  ;;  %v250_v35 = vld [vmem:[#allocation5 + $0xf0] sm:$0xff]  ;;  %v245_v36 = vld [vmem:[#allocation5 + $0xc8] sm:$0xff]  ;;  %v247_v37 = vld [vmem:[#allocation5 + $0xd8] sm:$0xff] }
  0x63   : > { %382 = vmatprep.subr.mxu0 %v257_v24  ;;  %459 = vmatprep.subr.mxu1 %v259_v25  ;;  %v244_v38 = vld [vmem:[#allocation5 + $0xc0] sm:$0xff]  ;;  %v246_v39 = vld [vmem:[#allocation5 + $0xd0] sm:$0xff]  ;;  %v241_v40 = vld [vmem:[#allocation5 + $0xa8] sm:$0xff] }
  0x64   : > { %383 = vmatpush1.msra.mxu0 %v256_v26  ;;  %460 = vmatpush1.msra.mxu1 %v258_v27  ;;  %v243_v41 = vld [vmem:[#allocation5 + $0xb8] sm:$0xff]  ;;  %v240_v42 = vld [vmem:[#allocation5 + $0xa0] sm:$0xff]  ;;  %v242_v43 = vld [vmem:[#allocation5 + $0xb0] sm:$0xff] }
  0x65   : > { %384 = vmatprep.subr.mxu0 %v253_v28  ;;  %461 = vmatprep.subr.mxu1 %v255_v29  ;;  %v237_v44 = vld [vmem:[#allocation5 + $0x88] sm:$0xff]  ;;  %v239_v45 = vld [vmem:[#allocation5 + $0x98] sm:$0xff]  ;;  %v236_v46 = vld [vmem:[#allocation5 + $0x80] sm:$0xff] }
  0x66   : > { %385 = vmatpush1.msra.mxu0 %v252_v30  ;;  %462 = vmatpush1.msra.mxu1 %v254_v31  ;;  %v238_v47 = vld [vmem:[#allocation5 + $0x90] sm:$0xff]  ;;  %v233_v48 = vld [vmem:[#allocation5 + $0x68] sm:$0xff]  ;;  %v235_v49 = vld [vmem:[#allocation5 + $0x78] sm:$0xff] }
  0x67   : > { %386 = vmatprep.subr.mxu0 %v249_v32  ;;  %463 = vmatprep.subr.mxu1 %v251_v33  ;;  %v232_v50 = vld [vmem:[#allocation5 + $0x60] sm:$0xff]  ;;  %v234_v51 = vld [vmem:[#allocation5 + $0x70] sm:$0xff]  ;;  %v229_v52 = vld [vmem:[#allocation5 + $0x48] sm:$0xff] }
  0x68   : > { %387 = vmatpush1.msra.mxu0 %v248_v34  ;;  %464 = vmatpush1.msra.mxu1 %v250_v35  ;;  %v231_v53 = vld [vmem:[#allocation5 + $0x58] sm:$0xff]  ;;  %v228_v54 = vld [vmem:[#allocation5 + $0x40] sm:$0xff]  ;;  %v230_v55 = vld [vmem:[#allocation5 + $0x50] sm:$0xff] }
  0x69   : > { %388 = vmatprep.subr.mxu0 %v245_v36  ;;  %465 = vmatprep.subr.mxu1 %v247_v37  ;;  %v225_v56 = vld [vmem:[#allocation5 + $0x28] sm:$0xff]  ;;  %v227_v57 = vld [vmem:[#allocation5 + $0x38] sm:$0xff]  ;;  %v224_v58 = vld [vmem:[#allocation5 + $0x20] sm:$0xff] }
  0x6a   : > { %389 = vmatpush1.msra.mxu0 %v244_v38  ;;  %466 = vmatpush1.msra.mxu1 %v246_v39  ;;  %v226_v59 = vld [vmem:[#allocation5 + $0x30] sm:$0xff]  ;;  %v221_v60 = vld [vmem:[#allocation5 + $0x8] sm:$0xff]  ;;  %v223_v61 = vld [vmem:[#allocation5 + $0x18] sm:$0xff] }
  0x6b   : > { %390 = vmatprep.subr.mxu0 %v241_v40  ;;  %467 = vmatprep.subr.mxu1 %v243_v41  ;;  %v220_v62 = vld [vmem:[#allocation5] sm:$0xff]  ;;  %v222_v63 = vld [vmem:[#allocation5 + $0x10] sm:$0xff]  ;;  %v345_v0 = vld [vmem:[#allocation5 + $0x3e8] sm:$0xff] }
  0x6c   : > { %391 = vmatpush1.msra.mxu0 %v240_v42  ;;  %468 = vmatpush1.msra.mxu1 %v242_v43  ;;  %v347_v1 = vld [vmem:[#allocation5 + $0x3f8] sm:$0xff]  ;;  %v344_v2 = vld [vmem:[#allocation5 + $0x3e0] sm:$0xff]  ;;  %v346_v3 = vld [vmem:[#allocation5 + $0x3f0] sm:$0xff] }
  0x6d   : > { %392 = vmatprep.subr.mxu0 %v237_v44  ;;  %469 = vmatprep.subr.mxu1 %v239_v45  ;;  %v341_v4 = vld [vmem:[#allocation5 + $0x3c8] sm:$0xff]  ;;  %v343_v5 = vld [vmem:[#allocation5 + $0x3d8] sm:$0xff]  ;;  %v340_v6 = vld [vmem:[#allocation5 + $0x3c0] sm:$0xff] }
  0x6e   : > { %393 = vmatpush1.msra.mxu0 %v236_v46  ;;  %470 = vmatpush1.msra.mxu1 %v238_v47  ;;  %v342_v7 = vld [vmem:[#allocation5 + $0x3d0] sm:$0xff]  ;;  %v337_v8 = vld [vmem:[#allocation5 + $0x3a8] sm:$0xff]  ;;  %v339_v9 = vld [vmem:[#allocation5 + $0x3b8] sm:$0xff] }
  0x6f   : > { %394 = vmatprep.subr.mxu0 %v233_v48  ;;  %471 = vmatprep.subr.mxu1 %v235_v49  ;;  %v336_v10 = vld [vmem:[#allocation5 + $0x3a0] sm:$0xff]  ;;  %v338_v11 = vld [vmem:[#allocation5 + $0x3b0] sm:$0xff]  ;;  %v333_v12 = vld [vmem:[#allocation5 + $0x388] sm:$0xff] }
  0x70   : > { %395 = vmatpush1.msra.mxu0 %v232_v50  ;;  %472 = vmatpush1.msra.mxu1 %v234_v51  ;;  %v335_v13 = vld [vmem:[#allocation5 + $0x398] sm:$0xff]  ;;  %v332_v14 = vld [vmem:[#allocation5 + $0x380] sm:$0xff]  ;;  %v334_v15 = vld [vmem:[#allocation5 + $0x390] sm:$0xff] }
  0x71   : > { %396 = vmatprep.subr.mxu0 %v229_v52  ;;  %473 = vmatprep.subr.mxu1 %v231_v53  ;;  %v329_v16 = vld [vmem:[#allocation5 + $0x368] sm:$0xff]  ;;  %v331_v17 = vld [vmem:[#allocation5 + $0x378] sm:$0xff]  ;;  %v328_v18 = vld [vmem:[#allocation5 + $0x360] sm:$0xff] }
  0x72   : > { %397 = vmatpush1.msra.mxu0 %v228_v54  ;;  %474 = vmatpush1.msra.mxu1 %v230_v55  ;;  %v330_v19 = vld [vmem:[#allocation5 + $0x370] sm:$0xff]  ;;  %v325_v20 = vld [vmem:[#allocation5 + $0x348] sm:$0xff]  ;;  %v327_v21 = vld [vmem:[#allocation5 + $0x358] sm:$0xff] }
  0x73   : > { %398 = vmatprep.subr.mxu0 %v225_v56  ;;  %475 = vmatprep.subr.mxu1 %v227_v57  ;;  %v324_v22 = vld [vmem:[#allocation5 + $0x340] sm:$0xff]  ;;  %v326_v23 = vld [vmem:[#allocation5 + $0x350] sm:$0xff]  ;;  %v321_v24 = vld [vmem:[#allocation5 + $0x328] sm:$0xff] }
  0x74   : > { %399 = vmatpush1.msra.mxu0 %v224_v58  ;;  %476 = vmatpush1.msra.mxu1 %v226_v59  ;;  %v323_v25 = vld [vmem:[#allocation5 + $0x338] sm:$0xff]  ;;  %v320_v26 = vld [vmem:[#allocation5 + $0x320] sm:$0xff]  ;;  %v322_v27 = vld [vmem:[#allocation5 + $0x330] sm:$0xff] }
  0x75   : > { %400 = vmatprep.subr.mxu0 %v221_v60  ;;  %477 = vmatprep.subr.mxu1 %v223_v61  ;;  %v317_v28 = vld [vmem:[#allocation5 + $0x308] sm:$0xff]  ;;  %v319_v29 = vld [vmem:[#allocation5 + $0x318] sm:$0xff]  ;;  %v316_v30 = vld [vmem:[#allocation5 + $0x300] sm:$0xff] }
  0x76   : > { %401 = vmatpush1.msra.mxu0 %v220_v62  ;;  %478 = vmatpush1.msra.mxu1 %v222_v63  ;;  %v318_v31 = vld [vmem:[#allocation5 + $0x310] sm:$0xff]  ;;  %v313_v32 = vld [vmem:[#allocation5 + $0x2e8] sm:$0xff]  ;;  %v315_v33 = vld [vmem:[#allocation5 + $0x2f8] sm:$0xff] }
  0x77   : > { %402 = vmatprep.subr.mxu0 %v345_v0  ;;  %479 = vmatprep.subr.mxu1 %v347_v1  ;;  %v312_v34 = vld [vmem:[#allocation5 + $0x2e0] sm:$0xff]  ;;  %v314_v35 = vld [vmem:[#allocation5 + $0x2f0] sm:$0xff]  ;;  %v309_v36 = vld [vmem:[#allocation5 + $0x2c8] sm:$0xff] }
  0x78   : > { %403 = vmatpush2.msra.mxu0 %v344_v2  ;;  %480 = vmatpush2.msra.mxu1 %v346_v3  ;;  %v311_v37 = vld [vmem:[#allocation5 + $0x2d8] sm:$0xff]  ;;  %v308_v38 = vld [vmem:[#allocation5 + $0x2c0] sm:$0xff]  ;;  %v310_v39 = vld [vmem:[#allocation5 + $0x2d0] sm:$0xff] }
  0x79   : > { %404 = vmatprep.subr.mxu0 %v341_v4  ;;  %481 = vmatprep.subr.mxu1 %v343_v5  ;;  %v305_v40 = vld [vmem:[#allocation5 + $0x2a8] sm:$0xff]  ;;  %v307_v41 = vld [vmem:[#allocation5 + $0x2b8] sm:$0xff]  ;;  %v304_v42 = vld [vmem:[#allocation5 + $0x2a0] sm:$0xff]  ;;  %v350_v4 = vlaneseq }
  0x7a   : > { %405 = vmatpush2.msra.mxu0 %v340_v6  ;;  %482 = vmatpush2.msra.mxu1 %v342_v7  ;;  %v306_v43 = vld [vmem:[#allocation5 + $0x2b0] sm:$0xff]  ;;  %v301_v44 = vld [vmem:[#allocation5 + $0x288] sm:$0xff]  ;;  %v303_v45 = vld [vmem:[#allocation5 + $0x298] sm:$0xff] }
  0x7b   : > { %406 = vmatprep.subr.mxu0 %v337_v8  ;;  %483 = vmatprep.subr.mxu1 %v339_v9  ;;  %v300_v46 = vld [vmem:[#allocation5 + $0x280] sm:$0xff]  ;;  %v302_v47 = vld [vmem:[#allocation5 + $0x290] sm:$0xff]  ;;  %v297_v48 = vld [vmem:[#allocation5 + $0x268] sm:$0xff]  ;;  %v351_v5 = vshrl.u32 %v350_v4, 7 }
  0x7c   : > { %407 = vmatpush2.msra.mxu0 %v336_v10  ;;  %484 = vmatpush2.msra.mxu1 %v338_v11  ;;  %v299_v49 = vld [vmem:[#allocation5 + $0x278] sm:$0xff]  ;;  %v296_v50 = vld [vmem:[#allocation5 + $0x260] sm:$0xff]  ;;  %v298_v51 = vld [vmem:[#allocation5 + $0x270] sm:$0xff] }
  0x7d   : > { %408 = vmatprep.subr.mxu0 %v333_v12  ;;  %485 = vmatprep.subr.mxu1 %v335_v13  ;;  %v293_v52 = vld [vmem:[#allocation5 + $0x248] sm:$0xff]  ;;  %v295_v53 = vld [vmem:[#allocation5 + $0x258] sm:$0xff]  ;;  %v292_v54 = vld [vmem:[#allocation5 + $0x240] sm:$0xff]  ;;  %v352_v6 = vsub.s32 0, %v351_v5  ;;  %v360_v7 = vsub.s32 2, %v351_v5  ;;  %v356_v9 = vsub.s32 1, %v351_v5 }
  0x7e   : > { %409 = vmatpush2.msra.mxu0 %v332_v14  ;;  %486 = vmatpush2.msra.mxu1 %v334_v15  ;;  %v294_v55 = vld [vmem:[#allocation5 + $0x250] sm:$0xff]  ;;  %v289_v56 = vld [vmem:[#allocation5 + $0x228] sm:$0xff]  ;;  %v291_v57 = vld [vmem:[#allocation5 + $0x238] sm:$0xff]  ;;  %v364_v10 = vsub.s32 3, %v351_v5 }
  0x7f   : > { %410 = vmatprep.subr.mxu0 %v329_v16  ;;  %487 = vmatprep.subr.mxu1 %v331_v17  ;;  %v288_v58 = vld [vmem:[#allocation5 + $0x220] sm:$0xff]  ;;  %v290_v59 = vld [vmem:[#allocation5 + $0x230] sm:$0xff]  ;;  %v285_v60 = vld [vmem:[#allocation5 + $0x208] sm:$0xff] }
  0x80   : > { %411 = vmatpush2.msra.mxu0 %v328_v18  ;;  %488 = vmatpush2.msra.mxu1 %v330_v19  ;;  %v287_v61 = vld [vmem:[#allocation5 + $0x218] sm:$0xff]  ;;  %v284_v62 = vld [vmem:[#allocation5 + $0x200] sm:$0xff]  ;;  %v217_v63 = vld [vmem:[%s1042_s6 + $0x8] sm:$0xff] }
  0x81   : > { %412 = vmatprep.subr.mxu0 %v325_v20  ;;  %489 = vmatprep.subr.mxu1 %v327_v21  ;;  %v286_v0 = vld [vmem:[#allocation5 + $0x210] sm:$0xff]  ;;  %v216_v1 = vld [vmem:[%s1042_s6] sm:$0xff]  ;;  %v219_v2 = vld [vmem:[%s1042_s6 + $0x18] sm:$0xff] }
  0x82   : > { %413 = vmatpush2.msra.mxu0 %v324_v22  ;;  %490 = vmatpush2.msra.mxu1 %v326_v23  ;;  %v218_v3 = vld [vmem:[%s1042_s6 + $0x10] sm:$0xff]  ;;  %v348_v8 = vld [vmem:[#allocation7] sm:$0xf] }
  0x83   : > { %414 = vmatprep.subr.mxu0 %v321_v24  ;;  %491 = vmatprep.subr.mxu1 %v323_v25  ;;  %v353_v11 = vrot.slane %v348_v8, %v352_v6  ;;  %v361_v12 = vrot.slane %v348_v8, %v360_v7  ;;  %v357_v13 = vrot.slane %v348_v8, %v356_v9 }
  0x84   : > { %415 = vmatpush2.msra.mxu0 %v320_v26  ;;  %492 = vmatpush2.msra.mxu1 %v322_v27  ;;  %v365_v14 = vrot.slane %v348_v8, %v364_v10 }
  0x85   : > { %416 = vmatprep.subr.mxu0 %v317_v28  ;;  %493 = vmatprep.subr.mxu1 %v319_v29 }
  0x86   : > { %417 = vmatpush2.msra.mxu0 %v316_v30  ;;  %494 = vmatpush2.msra.mxu1 %v318_v31 }
  0x87   : > { %418 = vmatprep.subr.mxu0 %v313_v32  ;;  %495 = vmatprep.subr.mxu1 %v315_v33 }
  0x88   : > { %419 = vmatpush2.msra.mxu0 %v312_v34  ;;  %496 = vmatpush2.msra.mxu1 %v314_v35 }
  0x89   : > { %420 = vmatprep.subr.mxu0 %v309_v36  ;;  %497 = vmatprep.subr.mxu1 %v311_v37 }
  0x8a   : > { %421 = vmatpush2.msra.mxu0 %v308_v38  ;;  %498 = vmatpush2.msra.mxu1 %v310_v39 }
  0x8b   : > { %422 = vmatprep.subr.mxu0 %v305_v40  ;;  %499 = vmatprep.subr.mxu1 %v307_v41 }
  0x8c   : > { %423 = vmatpush2.msra.mxu0 %v304_v42  ;;  %500 = vmatpush2.msra.mxu1 %v306_v43 }
  0x8d   : > { %424 = vmatprep.subr.mxu0 %v301_v44  ;;  %501 = vmatprep.subr.mxu1 %v303_v45 }
  0x8e   : > { %425 = vmatpush2.msra.mxu0 %v300_v46  ;;  %502 = vmatpush2.msra.mxu1 %v302_v47 }
  0x8f   : > { %426 = vmatprep.subr.mxu0 %v297_v48  ;;  %503 = vmatprep.subr.mxu1 %v299_v49 }
  0x90   : > { %427 = vmatpush2.msra.mxu0 %v296_v50  ;;  %504 = vmatpush2.msra.mxu1 %v298_v51 }
  0x91   : > { %428 = vmatprep.subr.mxu0 %v293_v52  ;;  %505 = vmatprep.subr.mxu1 %v295_v53 }
  0x92   : > { %429 = vmatpush2.msra.mxu0 %v292_v54  ;;  %506 = vmatpush2.msra.mxu1 %v294_v55 }
  0x93   : > { %430 = vmatprep.subr.mxu0 %v289_v56  ;;  %507 = vmatprep.subr.mxu1 %v291_v57 }
  0x94   : > { %431 = vmatpush2.msra.mxu0 %v288_v58  ;;  %508 = vmatpush2.msra.mxu1 %v290_v59 }
  0x95   : > { %432 = vmatprep.subr.mxu0 %v285_v60  ;;  %509 = vmatprep.subr.mxu1 %v287_v61 }
  0x96   : > { %433 = vmatpush2.msra.mxu0 %v284_v62  ;;  %434 = vmatprep.mubr.f32.mxu0 %v217_v63 }
  0x97   : > { %510 = vmatpush2.msra.mxu1 %v286_v0  ;;  %511 = vmatprep.mubr.f32.mxu1 %v217_v63 }
  0x98   : > { %435 = vmatmul.mubr.f32.vlgmr.msra.gmra.mxu0 %v216_v1  ;;  %512 = vmatmul.mubr.f32.vlgmr.msra.gmra.mxu1 %v216_v1 }
  0x99   : > { %440 = vmatprep.mubr.f32.mxu0 %v219_v2  ;;  %517 = vmatprep.mubr.f32.mxu1 %v219_v2 }
  0x9c   : > { %441 = vmatmul.mubr.f32.gmra.mxu0 %v218_v3  ;;  %518 = vmatmul.mubr.f32.gmra.mxu1 %v218_v3 }
 0x158   : > { %v436_v15 = vpop.f32.mrf.mxu0  ;;  %v513_v16 = vpop.f32.mrf.mxu1 }
 0x159   : > { %v437_v17 = vadd.f32 %v436_v15, %v353_v11  ;;  %v514_v18 = vadd.f32 %v513_v16, %v361_v12 }
 0x15a   : > { %v438_v19 = vpop.f32.mrf.mxu0  ;;  %v515_v20 = vpop.f32.mrf.mxu1 }
 0x15b   : > { %524 = vst [vmem:[%s215_s20] sm:$0xff] %v437_v17  ;;  %526 = vst [vmem:[%s215_s20 + $0x10] sm:$0xff] %v514_v18  ;;  %v439_v21 = vadd.f32 %v438_v19, %v357_v13  ;;  %v516_v22 = vadd.f32 %v515_v20, %v365_v14 }
 0x15c   : > { %v442_v23 = vpop.f32.mrf.mxu0  ;;  %v519_v24 = vpop.f32.mrf.mxu1 }
 0x15d   : > { %525 = vst [vmem:[%s215_s20 + $0x8] sm:$0xff] %v439_v21  ;;  %527 = vst [vmem:[%s215_s20 + $0x18] sm:$0xff] %v516_v22  ;;  %v443_v25 = vadd.f32 %v442_v23, %v353_v11  ;;  %v520_v26 = vadd.f32 %v519_v24, %v361_v12 }
 0x15e   : > { %v444_v27 = vpop.f32.mrf.mxu0  ;;  %v521_v28 = vpop.f32.mrf.mxu1 }
 0x15f   : > { %528 = vst [vmem:[%s215_s20 + $0x20] sm:$0xff] %v443_v25  ;;  %530 = vst [vmem:[%s215_s20 + $0x30] sm:$0xff] %v520_v26  ;;  %v445_v29 = vadd.f32 %v444_v27, %v357_v13  ;;  %v522_v30 = vadd.f32 %v521_v28, %v365_v14 }
 0x161   : > { %529 = vst [vmem:[%s215_s20 + $0x28] sm:$0xff] %v445_v29  ;;  %531 = vst [vmem:[%s215_s20 + $0x38] sm:$0xff] %v522_v30 }
 0x162   : > { %824 = shalt.err (!%p821_p9)
}
 0x163   : > { %s825_s23 = scalar_lea.hbm %s1063_s8, 1024  ;;  %s829_s4 = scalar_lea.hbm %s1109_s3, 2048 }
 0x164   : > { %p826_p13 = scmp.ne.s32.totalorder %s1063_s8, %s825_s23  ;;  %p830_p4 = scmp.lt.s32.totalorder %s1063_s8, %s1109_s3 }
 0x165   : > { %p831_p8 = scmp.lt.s32.totalorder %s829_s4, %s825_s23 }
 0x166   : > { %p827_p5 = pnand %p826_p13, %p1125_p10 }
 0x167   : > { %p832_p3 = por %p831_p8, %p830_p4 }
 0x168   : > { %p828_p0 = pneg %p827_p5 }
 0x16a   : > { %p833_p11 = pnand %p832_p3, %p828_p0 }
 0x16c   : > { %836 = shalt.err (!%p833_p11)
}
 0x16d   : > { %s889_s18 = smov 512   ;;  %s890_s20 = smov 32  }
 0x16e   : > { %668 = dma.vmem_to_hbm [thread:$0]  (%p1125_p10), %s1058_s25, 1024, %s1063_s8, %s533_s16, %s889_s18, %s889_s18, %s890_s20  }
 0x16f PF: > { %s561_s27 = sand.u32 1, %s867_s12   ;;  %p1126_p1 = scmp.ne.s32.totalorder %s1115_s19, 0 }
 0x170   : > { %p1127_p2 = scmp.ge.s32.totalorder %s879_s15, 2  ;;  %s562_s28 = scalar_lea.sflag [#allocation4], %s561_s27 }
 0x172   : > { %p682_p6 = pnand %p1127_p2, %p1126_p1 }
 0x174   : > { %p683_p12 = pneg %p682_p6 }
 0x176   : > { %862 = dma.done.wait (%p683_p12), %s562_s28, 1024  }
 0x177   : > { %864 = vsyncadd (%p683_p12), %s562_s28, 4294966272  ;;  %p17_p7 = scmp.ge.s32.totalorder %s983_s7, 4   ;;  %s1128_s12 = smov %s871_s13 }
 0x178   : > { %s1129_s13 = smov %s875_s14  ;;  %s1130_s14 = smov %s999_s11 }
 0x179   : > { %s1131_s15 = smov %s983_s7  ;;  %19 = sbr.rel (!%p17_p7) target bundleno = 6 (0x6), region = 85 }
 0x17e   :  { %567 = vsyncpa [#allocation3], 1 }
 0x17f   :  { %569 = vsyncpa [#allocation3 + $0x1], 1 }
 0x180   :  { %570 = vsyncpa [#allocation6], 1 }
 0x181   :  { %571 = vsyncpa [#allocation4], 1 }
 0x182   :  { %573 = vsyncpa [#allocation4 + $0x1], 1 }

</bundles_post_ra>
